<compile_context>
chip_gen: v5e
topology: v5e:2x2
jax: 0.10.0
libtpu: 0.0.40
codegen_flags: <defaults>
</compile_context>

<pallas_src>
import jax
import jax.numpy as jnp
from jax import lax
from jax.experimental import pallas as pl
from jax.experimental.pallas import tpu as pltpu


def _attention_pooler_kernel(x_ref, mask_ref, w_ref, b_ref, out_ref):
    # x_ref    : (Bn, L, d)  VMEM, native input dtype (f32 / bf16 / ...)
    # mask_ref : (Bn, L)     VMEM int32 (0 == masked-out position)
    # w_ref    : (1, d)      VMEM f32  (attention_layer.weight, lane-major)
    # b_ref    : (1,)        SMEM f32  (attention_layer.bias)
    # out_ref  : (Bn, d)     VMEM, x.dtype
    x = x_ref[...]                                             # (Bn, L, d)
    w = w_ref[...]                                             # (1, d) f32
    b = b_ref[0]                                               # scalar

    # scores = Linear(x).squeeze(-1) with f32 accumulation.  x is upcast
    # per-expression (no stored full-tile f32 copy is reused later); one
    # multiply + lane-reduce per element (VPU + XLU), well under HBM roofline.
    scores = jnp.sum(x * w[None, :, :], axis=-1) + b           # (Bn, L) f32

    # masked_fill(mask == 0, -inf).
    # NOTE: a fully-masked row produces NaN, identical to the PyTorch module.
    scores = jnp.where(mask_ref[...] == 0, jnp.float32(-jnp.inf), scores)

    # Softmax over L (lane axis -> full-width vregs).  Keep p UNNORMALIZED;
    # the 1/denom scaling is applied to the small (Bn, d) result instead of
    # the (Bn, L) weights.
    m = jnp.max(scores, axis=-1, keepdims=True)                # (Bn, 1)
    p = jnp.exp(scores - m)                                    # (Bn, L) f32
    denom = jnp.sum(p, axis=-1, keepdims=True)                 # (Bn, 1)

    if x.dtype == jnp.float32:
        # f32 inputs: exact f32 VPU path (kernel is HBM-bound at f32 input
        # bandwidth anyway), keeps strict agreement with the reference.
        inv = 1.0 / denom                                      # (Bn, 1)
        att = jnp.sum(p[:, :, None] * x, axis=1)               # (Bn, d) f32
    else:
        # Sub-f32 inputs (bf16, ...): weighted sum on the otherwise-idle MXU,
        # per-batch (1, L) @ (L, d) with f32 accumulation.  The module's
        # `x * mask` stays dropped: weights are exactly 0 wherever mask == 0.
        inv = pl.reciprocal(denom, approx=True)                # EUP slot
        p3 = p.astype(x.dtype)[:, None, :]                     # (Bn, 1, L)
        att3 = lax.dot_general(
            p3, x,
            dimension_numbers=(((2,), (1,)), ((0,), (0,))),
            preferred_element_type=jnp.float32)                # (Bn, 1, d)
        att = att3[:, 0, :]                                    # (Bn, d) f32

    out_ref[...] = (att * inv).astype(out_ref.dtype)


def _choose_block_n(n, l, d, itemsize, target_bytes):
    """Batch rows per grid step:
      * multiple of 8 (sublane tiling of the (Bn, L)/(Bn, d) blocks),
      * x tile ~target_bytes (amortizes the ~0.35us per-step pipeline overhead
        without blowing scoped VMEM),
      * >= 4 grid steps when the batch is large enough (keeps the DMA pipeline
        busy; v7x's two TensorCores each get >= 2 steps),
      * capped at 256 so the per-batch MXU matmul unroll stays reasonable,
      * never larger than the batch itself.
    """
    if n <= 8:
        return int(n)                          # single block == full batch
    per_row = max(1, l * d * itemsize)
    bn = max(8, (target_bytes // per_row) // 8 * 8)
    if n >= 32:
        bn = min(bn, max(8, (n // 4) // 8 * 8))
    bn = min(bn, 256)
    bn = min(bn, (n // 8) * 8)
    return int(bn)


def attention_pooler(x, mask, weight, bias, *, block_n=None,
                     target_bytes=3 * 1024 * 1024):
    """
    x      : [N, L, d]  (any float dtype; streamed over HBM in its native dtype)
    mask   : [N, L]     (int/bool/float; nonzero == keep)
    weight : [1, d]     (nn.Linear(input_dim, 1).weight)
    bias   : [1]        (nn.Linear(input_dim, 1).bias)
    returns: [N, d]     in x.dtype
    """
    N, L, d = x.shape
    if block_n is None:
        block_n = _choose_block_n(N, L, d, x.dtype.itemsize, target_bytes)
    grid = (pl.cdiv(N, block_n),)

    w_row = weight.reshape(1, d).astype(jnp.float32)   # (1, d), lane-major
    b = bias.reshape(1).astype(jnp.float32)            # (1,) scalar -> SMEM
    mask_i = mask.astype(jnp.int32)
    # TODO(synk): ship the mask as int8 with 32-row-aligned blocks to cut its
    # DMA stream 4x; it is d-times smaller than x, so int32 is kept here.

    return pl.pallas_call(
        _attention_pooler_kernel,
        out_shape=jax.ShapeDtypeStruct((N, d), x.dtype),
        grid_spec=pltpu.PrefetchScalarGridSpec(
            num_scalar_prefetch=0,
            grid=grid,
            in_specs=[
                pl.BlockSpec((block_n, L, d), lambda n: (n, 0, 0)),
                pl.BlockSpec((block_n, L), lambda n: (n, 0)),
                pl.BlockSpec((1, d), lambda n: (0, 0)),
                pl.BlockSpec(memory_space=pltpu.MemorySpace.SMEM),
            ],
            out_specs=pl.BlockSpec((block_n, d), lambda n: (n, 0)),
        ),
        compiler_params=pltpu.CompilerParams(
            dimension_semantics=("parallel",),
            vmem_limit_bytes=48 * 1024 * 1024,
        ),
    )(x, mask_i, w_row, b)


def _reference(x, mask, weight, bias):
    # Plain-JAX mirror of the PyTorch forward (f32 math).
    xf = x.astype(jnp.float32)
    scores = jnp.einsum("nld,od->nlo", xf, weight.astype(jnp.float32))[..., 0]
    scores = scores + bias.astype(jnp.float32)[0]                      # (N, L)
    scores = jnp.where(mask == 0, -jnp.inf, scores)
    w = jax.nn.softmax(scores, axis=1)                                 # (N, L)
    masked_x = xf * (mask != 0)[..., None].astype(jnp.float32)         # (N, L, d)
    return jnp.einsum("nl,nld->nd", w, masked_x)                       # (N, d) f32


if __name__ == "__main__":
    # N=13 with block_n=8 exercises both a full and a partial (OOB) last block.
    N, L, d = 13, 8, 32
    key = jax.random.PRNGKey(0)
    kx, kw, kb = jax.random.split(key, 3)

    x = jax.random.normal(kx, (N, L, d), dtype=jnp.float32)
    # variable-length-style mask: valid lengths 1..L
    lengths = (jnp.arange(N, dtype=jnp.int32) % L) + 1
    mask = (jnp.arange(L)[None, :] < lengths[:, None]).astype(jnp.int32)  # (N, L)

    # Deterministic "Linear(input_dim, 1)" parameters (synthetic init).
    weight = jax.random.normal(kw, (1, d), dtype=jnp.float32) * 0.05
    bias = jax.random.normal(kb, (1,), dtype=jnp.float32) * 0.05

    ref = _reference(x, mask, weight, bias)

    # f32 path (strict check; exact f32 VPU path inside the kernel)
    out = attention_pooler(x, mask, weight, bias)
    out = jax.block_until_ready(out)
    assert out.shape == (N, d)
    assert jnp.allclose(out, ref, atol=1e-5, rtol=1e-5), (
        f"f32 max abs err = {jnp.max(jnp.abs(out - ref))}"
    )

    # bf16-over-HBM path (native-dtype streaming, MXU weighted sum, f32 accum)
    out_bf16 = attention_pooler(x.astype(jnp.bfloat16), mask, weight, bias)
    out_bf16 = jax.block_until_ready(out_bf16)
    assert out_bf16.shape == (N, d)
    assert jnp.allclose(out_bf16.astype(jnp.float32), ref, atol=5e-2, rtol=5e-2), (
        f"bf16 max abs err = {jnp.max(jnp.abs(out_bf16.astype(jnp.float32) - ref))}"
    )

    print("KERNEL_OK")
</pallas_src>

<mosaic_0001>
module attributes {stable_mosaic.version = 11 : i64} {
  func.func @_attention_pooler_kernel(%arg0: i32, %arg1: memref<8x8x32xf32, #tpu.memory_space<vmem>>, %arg2: memref<8x8xi32, #tpu.memory_space<vmem>>, %arg3: memref<1x32xf32, #tpu.memory_space<vmem>>, %arg4: memref<1xf32, #tpu.memory_space<smem>>, %arg5: memref<8x32xf32, #tpu.memory_space<vmem>>) attributes {dimension_semantics = [#tpu.dimension_semantics<parallel>], iteration_bounds = array<i64: 2>, scalar_prefetch = 0 : i64, scratch_operands = 0 : i64, tpu.core_type = #tpu.core_type<tc>, window_params = [{transform_indices = @transform_0, window_bounds = array<i64: 8, 8, 32>}, {transform_indices = @transform_1, window_bounds = array<i64: 8, 8>}, {pipeline_mode = #tpu.pipeline_mode<synchronous>, transform_indices = @transform_2, window_bounds = array<i64: 1, 32>}, {transform_indices = @transform_3, window_bounds = array<i64: 1>}, {transform_indices = @transform_4, window_bounds = array<i64: 8, 32>}]} {
    %c0 = arith.constant 0 : index
    %c0_0 = arith.constant 0 : index
    %c0_1 = arith.constant 0 : index
    %0 = vector.load %arg1[%c0, %c0_0, %c0_1] : memref<8x8x32xf32, #tpu.memory_space<vmem>>, vector<8x8x32xf32>
    %c0_2 = arith.constant 0 : index
    %c0_3 = arith.constant 0 : index
    %1 = vector.load %arg3[%c0_2, %c0_3] : memref<1x32xf32, #tpu.memory_space<vmem>>, vector<1x32xf32>
    %c0_4 = arith.constant 0 : index
    %2 = memref.load %arg4[%c0_4] : memref<1xf32, #tpu.memory_space<smem>>
    %3 = vector.shape_cast %1 : vector<1x32xf32> to vector<1x1x32xf32>
    %4 = vector.broadcast %3 : vector<1x1x32xf32> to vector<8x8x32xf32>
    %5 = arith.mulf %0, %4 : vector<8x8x32xf32>
    %cst = arith.constant dense<0.000000e+00> : vector<8x8xf32>
    %6 = vector.multi_reduction <add>, %5, %cst [2] : vector<8x8x32xf32> to vector<8x8xf32>
    %7 = vector.broadcast %2 : f32 to vector<8x8xf32>
    %8 = arith.addf %6, %7 : vector<8x8xf32>
    %c0_5 = arith.constant 0 : index
    %c0_6 = arith.constant 0 : index
    %9 = vector.load %arg2[%c0_5, %c0_6] : memref<8x8xi32, #tpu.memory_space<vmem>>, vector<8x8xi32>
    %c0_i32 = arith.constant 0 : i32
    %10 = vector.broadcast %c0_i32 : i32 to vector<8x8xi32>
    %11 = arith.cmpi eq, %9, %10 : vector<8x8xi32>
    %cst_7 = arith.constant 0xFF800000 : f32
    %12 = vector.broadcast %cst_7 : f32 to vector<8x8xf32>
    %13 = arith.select %11, %12, %8 : vector<8x8xi1>, vector<8x8xf32>
    %cst_8 = arith.constant dense<0xFF800000> : vector<8xf32>
    %14 = vector.multi_reduction <maximumf>, %13, %cst_8 [1] : vector<8x8xf32> to vector<8xf32>
    %15 = vector.shape_cast %14 : vector<8xf32> to vector<8x1xf32>
    %16 = vector.broadcast %15 : vector<8x1xf32> to vector<8x8xf32>
    %17 = arith.subf %13, %16 : vector<8x8xf32>
    %18 = math.exp %17 : vector<8x8xf32>
    %cst_9 = arith.constant dense<0.000000e+00> : vector<8xf32>
    %19 = vector.multi_reduction <add>, %18, %cst_9 [1] : vector<8x8xf32> to vector<8xf32>
    %20 = vector.shape_cast %19 : vector<8xf32> to vector<8x1xf32>
    %cst_10 = arith.constant 1.000000e+00 : f32
    %21 = vector.broadcast %cst_10 : f32 to vector<8x1xf32>
    %22 = arith.divf %21, %20 : vector<8x1xf32>
    %23 = vector.shape_cast %18 : vector<8x8xf32> to vector<8x8x1xf32>
    %24 = vector.broadcast %23 : vector<8x8x1xf32> to vector<8x8x32xf32>
    %25 = arith.mulf %24, %0 : vector<8x8x32xf32>
    %cst_11 = arith.constant dense<0.000000e+00> : vector<8x32xf32>
    %26 = vector.multi_reduction <add>, %25, %cst_11 [1] : vector<8x8x32xf32> to vector<8x32xf32>
    %27 = vector.broadcast %22 : vector<8x1xf32> to vector<8x32xf32>
    %28 = arith.mulf %26, %27 : vector<8x32xf32>
    %c0_12 = arith.constant 0 : index
    %c0_13 = arith.constant 0 : index
    %29 = vector.load %arg5[%c0_12, %c0_13] : memref<8x32xf32, #tpu.memory_space<vmem>>, vector<8x32xf32>
    tpu.vector_store %arg5[%c0_12, %c0_13], %28 {strides = array<i32>} : memref<8x32xf32, #tpu.memory_space<vmem>>, vector<8x32xf32>,
    return
  }
  func.func @transform_0(%arg0: i32) -> (i32, i32, i32) {
    %c0_i32 = arith.constant 0 : i32
    %c0_i32_0 = arith.constant 0 : i32
    %c0_i32_1 = arith.constant 0 : i32
    return %arg0, %c0_i32, %c0_i32_0 : i32, i32, i32
  }
  func.func @transform_1(%arg0: i32) -> (i32, i32) {
    %c0_i32 = arith.constant 0 : i32
    %c0_i32_0 = arith.constant 0 : i32
    return %arg0, %c0_i32 : i32, i32
  }
  func.func @transform_2(%arg0: i32) -> (i32, i32) {
    %c0_i32 = arith.constant 0 : i32
    %c0_i32_0 = arith.constant 0 : i32
    %c0_i32_1 = arith.constant 0 : i32
    return %c0_i32, %c0_i32_0 : i32, i32
  }
  func.func @transform_3(%arg0: i32) -> i32 {
    %c0_i32 = arith.constant 0 : i32
    %c0_i32_0 = arith.constant 0 : i32
    return %c0_i32 : i32
  }
  func.func @transform_4(%arg0: i32) -> (i32, i32) {
    %c0_i32 = arith.constant 0 : i32
    %c0_i32_0 = arith.constant 0 : i32
    return %arg0, %c0_i32 : i32, i32
  }
}

</mosaic_0001>

<bundles_post_ra>
// kernel: tpu_custom_call.1
= control target key start
LH: loop header
LB: loop body
LE: loop exit
PB: predicated region body
PF: predicated region fallthrough
CT: control target
= control target key end

     0   :  { %s1053_s0 = inlined_call_operand.hbm [shape: f32[13,8,32], index: 0, kind: input, shape index: {}]   ;;  %s1054_s1 = inlined_call_operand.vmem [shape: s32[13,8], index: 1, kind: input, shape index: {}]   ;;  %s1055_s2 = inlined_call_operand.vmem [shape: f32[1,32], index: 2, kind: input, shape index: {}]   ;;  %s1056_s3 = inlined_call_operand.<no memory space> [shape: f32[1], index: 3, kind: input, shape index: {}]   ;;  %s1057_s4 = inlined_call_operand.hbm [shape: f32[13,32], index: 4, kind: output, shape index: {}]  }
   0x1   :  { %9 = sst [smem:[#allocation2]] %s1056_s3 }
   0x2   :  { %10 = vsyncpa [#allocation4], 0 }
   0x3   :  { %12 = vsyncpa [#allocation4 + $0x1], 0 }
   0x4   :  { %13 = vsyncpa [#allocation5], 0 }
   0x5   :  { %15 = vsyncpa [#allocation5 + $0x1], 0  ;;  %s837_s17 = smov 0   ;;  %s839_s18 = smov 0  }
   0x6   :  { %s841_s19 = smov 0   ;;  %s843_s20 = smov 0  }
   0x7 LB: > { %s858_s3 = sadd.s32 4294967295, %s804_s20   ;;  %s630_s21 = sadd.s32 4294967294, %s804_s20   ;;  %s804_s20 = sphi %s843_s20, %s1067_s20   ;;  %s800_s19 = sphi %s841_s19, %s1066_s19   ;;  %s796_s18 = sphi %s839_s18, %s1065_s18   ;;  %s792_s17 = sphi %s837_s17, %s1064_s17  }
   0x8   : > { %s862_s22 = sadd.s32 1, %s804_s20   ;;  %s28_s23 = sadd.s32 1, %s800_s19 }
   0x9   : > { %s25_s24 = ssub.s32 %s804_s20, %s862_s22  ;;  %p35_p0 = scmp.ne.s32.totalorder %s800_s19, %s796_s18 }
   0xa   : > { %p26_p1 = scmp.eq.s32.totalorder %s25_s24, 0  ;;  %p36_p2 = scmp.eq.s32.totalorder %s804_s20, 0 }
   0xb   : > { %p41_p3 = scmp.ne.s32.totalorder %s796_s18, %s792_s17  ;;  %p42_p4 = scmp.eq.s32.totalorder %s858_s3, 0 }
   0xc   : > { %s874_s25 = scalar_select %p26_p1, %s800_s19, %s28_s23  }
   0xd   : > { %p37_p5 = por %p36_p2, %p35_p0  ;;  %p876_p6 = por %p42_p4, %p41_p3 }
   0xe   : > { %p133_p7 = scmp.eq.s32.totalorder %s858_s3, 1  ;;  %p139_p8 = scmp.eq.s32.totalorder %s630_s21, 1 }
   0xf   : > { %p1058_p11 = scmp.ge.s32.totalorder %s804_s20, 2 }
  0x10   : > { %p881_p9 = por %p133_p7, %p35_p0  ;;  %p885_p10 = por %p139_p8, %p41_p3 }
  0x11   : > { %161 = sbr.rel (%p1058_p11) target bundleno = 58 (0x3a), region = 24 }
  0x16   : > { %164 = sbr.rel (!%p37_p5) target bundleno = 58 (0x3a), region = 28  ;;  %s165_s29 = sand.u32 (%p37_p5), 1, %s800_s19  }
  0x17   : > { %s634_s30 = sshll.u32 (%p37_p5), %s804_s20, 3  ;;  %s633_s5 = sshll.u32 (%p37_p5), %s165_s29, 6 }
  0x18   : > { %s171_s6 = ssub.s32 (%p37_p5), 13, %s634_s30  ;;  %s897_s10 = scalar_lea.sflag (%p37_p5), [#allocation4], %s165_s29 }
  0x19   : > { %p172_p12 = scmp.lt.s32.totalorder (%p37_p5), %s171_s6, 8  ;;  %s169_s11 = scalar_lea.vmem (%p37_p5), [#allocation3], %s633_s5 }
  0x1b   : > { %s1069_s6 = smov (!%p172_p12, %s171_s6), 8 }
  0x1c   : > { %s635_s7 = sshll.u32 %s1069_s6, 3 }
  0x1d   : > { %s175_s8 = ssub.s32 64, %s635_s7 }
  0x1e   : > { %s176_s9 = sshll.u32 %s175_s8, 4 }
  0x1f   : > { %177 = vsyncadd %s897_s10, %s176_s9  ;;  %p900_p13 = scmp.ne.s32.totalorder %s635_s7, 0  ;;  %s648_s13 = sshll.u32 %s804_s20, 6 }
  0x20   : > { %s180_s16 = scalar_lea.hbm %s1053_s0, %s648_s13  ;;  %s908_s21 = sshll.u32 %s169_s11, 4  ;;  %s185_s21 = int_to_ptr.vmem [resolvable:$true] %s908_s21 }
  0x21   : > { %s182_s23 = sshll.u32 %s180_s16, 4  ;;  %s639_s24 = sshll.u32 %s1069_s6, 7  ;;  %s911_s23 = int_to_ptr.hbm [resolvable:$true] %s182_s23 }
  0x22   : > { %s699_s29 = sshra.s32 %s911_s23, 4  ;;  %s701_s30 = sshrl.u32 %s639_s24, 4  ;;  %s700_s29 = int_to_ptr.hbm [resolvable:$true] %s699_s29 }
  0x23   : > { %s706_s5 = scalar_lea.hbm %s700_s29, %s701_s30  ;;  %s710_s9 = scalar_lea.hbm %s1053_s0, 104 }
  0x24   : > { %p707_p0 = scmp.ne.s32.totalorder %s700_s29, %s706_s5  ;;  %p711_p3 = scmp.lt.s32.totalorder %s700_s29, %s1053_s0 }
  0x25   : > { %p712_p4 = scmp.lt.s32.totalorder %s710_s9, %s706_s5 }
  0x26   : > { %p708_p1 = pnand %p707_p0, %p900_p13 }
  0x27   : > { %p713_p5 = por %p712_p4, %p711_p3 }
  0x28   : > { %p709_p2 = pneg %p708_p1 }
  0x2a   : > { %p714_p7 = pnand %p713_p5, %p709_p2 }
  0x2c   : > { %717 = shalt.err (!%p714_p7)
}
  0x2d   : > { %s718_s14 = sshra.s32 %s185_s21, 4  ;;  %s806_s16 = smov [#allocation3]   ;;  %s719_s14 = int_to_ptr.vmem [resolvable:$true] %s718_s14 }
  0x2e   : > { %s725_s15 = scalar_lea.vmem %s719_s14, %s701_s30  ;;  %s729_s7 = scalar_lea.vmem %s806_s16, 128 }
  0x2f   : > { %p726_p8 = scmp.ne.s32.totalorder %s719_s14, %s725_s15  ;;  %p731_p1 = scmp.lt.s32.totalorder %s729_s7, %s725_s15 }
  0x31   : > { %p727_p12 = pnand %p726_p8, %p900_p13 }
  0x33   : > { %p728_p0 = pneg %p727_p12 }
  0x35   : > { %p733_p11 = pnand %p731_p1, %p728_p0 }
  0x37   : > { %736 = shalt.err (!%p733_p11)
}
  0x38   : > { %s807_s29 = smov 128   ;;  %s808_s5 = smov 8  }
  0x39   : > { %190 = dma.hbm_to_vmem [thread:$0]  (%p900_p13), %s911_s23, %s639_s24, %s185_s21, %s897_s10, %s807_s29, %s807_s29, %s808_s5  }
  0x3a PF: > { %p640_p2 = scmp.ge.s32.totalorder %s804_s20, 1  ;;  %p199_p3 = scmp.lt.s32.totalorder %s804_s20, 3 }
  0x3c   : > { %p200_p4 = pnand %p640_p2, %p199_p3 }
  0x3d   : > { %s940_s30 = sand.u32 (!%p200_p4), 1, %s796_s18  }
  0x3e   : > { %203 = sbr.rel (%p200_p4) target bundleno = 503 (0x1f7), region = 36  ;;  %s641_s8 = sshll.u32 (!%p200_p4), %s940_s30, 6 }
  0x3f   : > { %s206_s9 = scalar_lea.sflag (!%p200_p4), [#allocation4], %s940_s30  ;;  %s209_s12 = scalar_lea.vmem (!%p200_p4), [#allocation3], %s641_s8 }
  0x43   : > { %783 = dma.done.wait (%p876_p6), %s206_s9, 1024  }
  0x44   : > { %785 = vsyncadd (%p876_p6), %s206_s9, 4294966272  ;;  %v948_v0 = vld [vmem:[%s209_s12] sm:$0xff]  ;;  %vm269_vm0 = vcmask 261120   ;;  %v953_v2 = vld [vmem:[%s209_s12 + $0x10] sm:$0xff]  ;;  %s257_s26 = sld [smem:[#allocation2]]  ;;  %v313_v28 = vlaneseq  ;;  %p244_p6 = scmp.lt.s32.totalorder %s858_s3, 1 }
  0x45   : > { %v694_v1 = vld [vmem:[%s1055_s2] ss:$0 sm:$0xff]  ;;  %v960_v7 = vld [vmem:[%s209_s12 + $0x8] sm:$0xff]  ;;  %v962_v8 = vld [vmem:[%s209_s12 + $0x18] sm:$0xff]  ;;  %vm323_vm1 = vcmask 1041409   ;;  %vm325_vm2 = vcmask 1042434  }
  0x46   : > { %v955_v3 = vld [vmem:[%s209_s12 + $0x20] sm:$0xff]  ;;  %v261_v4 = vmul.f32 %v694_v1, %v948_v0  ;;  %v263_v5 = vmul.f32 %v694_v1, %v953_v2  ;;  %v967_v12 = vld [vmem:[%s209_s12 + $0x28] sm:$0xff]  ;;  %v262_v13 = vmul.f32 %v694_v1, %v960_v7  ;;  %v264_v14 = vmul.f32 %v694_v1, %v962_v8  ;;  %v975_v19 = vld [vmem:[%s209_s12 + $0x30] sm:$0xff]  ;;  %s245_s21 = scalar_select %p244_p6, %s858_s3, 1 }
  0x47   : > { %v265_v6 = vmul.f32 %v694_v1, %v955_v3  ;;  %v266_v15 = vmul.f32 %v694_v1, %v967_v12  ;;  %v977_v20 = vld [vmem:[%s209_s12 + $0x38] sm:$0xff]  ;;  %v267_v21 = vmul.f32 %v694_v1, %v975_v19  ;;  %v314_v30 = vand.u32 127, %v313_v28  ;;  %s642_s14 = sshll.u32 %s940_s30, 3  ;;  %s645_s15 = sshll.u32 %s858_s3, 3 }
  0x48   : > { %v270_v9 = vsel %vm269_vm0, %v261_v4, 0.0  ;;  %v276_v10 = vsel %vm269_vm0, %v263_v5, 0.0  ;;  %v273_v16 = vsel %vm269_vm0, %v262_v13, 0.0  ;;  %v279_v17 = vsel %vm269_vm0, %v264_v14, 0.0  ;;  %s643_s23 = sshll.u32 %s245_s21, 3  ;;  %s543_s29 = scalar_lea.hbm %s1057_s4, %s645_s15 }
  0x49   : > { %v282_v11 = vsel %vm269_vm0, %v265_v6, 0.0  ;;  %271 = vadd.xlane.f32.xlu0 %v270_v9  ;;  %277 = vadd.xlane.f32.xlu1 %v276_v10  ;;  %v285_v18 = vsel %vm269_vm0, %v266_v15, 0.0  ;;  %v268_v22 = vmul.f32 %v694_v1, %v977_v20  ;;  %v288_v23 = vsel %vm269_vm0, %v267_v21, 0.0  ;;  %s247_s13 = scalar_lea.vmem %s1054_s1, %s643_s23  ;;  %s238_s3 = scalar_lea.vmem [#allocation6], %s642_s14 }
  0x4a   : > { %283 = vadd.xlane.f32.xlu2 %v282_v11  ;;  %v294_v29 = vstv %s257_s26  ;;  %vm327_vm3 = vcmask 1043459   ;;  %vm329_vm4 = vcmask 1044484   ;;  %v303_v53 = vld [vmem:[%s247_s13] sm:$0xff]  ;;  %vm331_vm5 = vcmask 1045509   ;;  %s545_s5 = sshll.u32 %s238_s3, 4  ;;  %s547_s8 = sshll.u32 %s543_s29, 4  ;;  %s546_s5 = int_to_ptr.vmem [resolvable:$true] %s545_s5  ;;  %s548_s8 = int_to_ptr.hbm [resolvable:$true] %s547_s8 }
  0x4b   : > { %v291_v24 = vsel %vm269_vm0, %v268_v22, 0.0  ;;  %vm333_vm6 = vcmask 1046534   ;;  %vm335_vm7 = vcmask 1047559   ;;  %vm304_vm8 = vcmp.eq.s32.totalorder %v303_v53, 0  ;;  %s533_s9 = scalar_lea.sflag [#allocation5], %s940_s30  ;;  %s752_s12 = sshra.s32 %s548_s8, 4  ;;  %s753_s12 = int_to_ptr.hbm [resolvable:$true] %s752_s12 }
  0x4c   : > { %vm339_vm9 = vcmask 64512   ;;  %v366_v62 = vshrl.u32 %v313_v28, 7  ;;  %s754_s6 = scalar_lea.hbm %s753_s12, 8  ;;  %s758_s21 = scalar_lea.hbm %s1057_s4, 16 }
  0x4d   : > { %p755_p11 = scmp.ne.s32.totalorder %s753_s12, %s754_s6  ;;  %p759_p7 = scmp.lt.s32.totalorder %s753_s12, %s1057_s4 }
  0x4e   : > { %692 = vset.pattern.permute.xlu2 %v366_v62  ;;  %691 = vset.pattern.permute.xlu1 %v366_v62  ;;  %p760_p8 = scmp.lt.s32.totalorder %s758_s21, %s754_s6 }
  0x4f   : > { %693 = vset.pattern.permute.xlu0 %v366_v62  ;;  %p756_p13 = pnand %p755_p11, %p881_p9 }
  0x50   : > { %p761_p12 = por %p760_p8, %p759_p7 }
  0x51   : > { %274 = vadd.xlane.f32.xlu0 %v273_v16  ;;  %280 = vadd.xlane.f32.xlu1 %v279_v17  ;;  %p757_p5 = pneg %p756_p13 }
  0x52   : > { %286 = vadd.xlane.f32.xlu2 %v285_v18 }
  0x53   : > { %p762_p0 = pnand %p761_p12, %p757_p5 }
  0x59   : > { %289 = vadd.xlane.f32.xlu0 %v288_v23  ;;  %292 = vadd.xlane.f32.xlu1 %v291_v24 }
  0xbc   : > { %v272_v25 = vpop.xlane.xlu0 %271  ;;  %v278_v26 = vpop.xlane.xlu1 %277 }
  0xbd   : > { %v284_v27 = vpop.xlane.xlu2 %283  ;;  %v295_v31 = vadd.f32 %v294_v29, %v272_v25  ;;  %v297_v32 = vadd.f32 %v294_v29, %v278_v26 }
  0xbe   : > { %v299_v39 = vadd.f32 %v294_v29, %v284_v27 }
  0xbf   : > { %v315_v38 = vperm.slane %v295_v31, %v314_v30  ;;  %v317_v42 = vperm.slane %v297_v32, %v314_v30 }
  0xc0   : > { %v319_v46 = vperm.slane %v299_v39, %v314_v30 }
  0xc4   : > { %v275_v33 = vpop.xlane.xlu0 %274  ;;  %v281_v34 = vpop.xlane.xlu1 %280 }
  0xc5   : > { %v296_v35 = vadd.f32 %v294_v29, %v275_v33  ;;  %v298_v36 = vadd.f32 %v294_v29, %v281_v34  ;;  %v287_v37 = vpop.xlane.xlu2 %286 }
  0xc6   : > { %v300_v43 = vadd.f32 %v294_v29, %v287_v37 }
  0xc7   : > { %v316_v40 = vperm.slane %v296_v35, %v314_v30  ;;  %v318_v41 = vperm.slane %v298_v36, %v314_v30 }
  0xc8   : > { %v320_v48 = vperm.slane %v300_v43, %v314_v30 }
  0xc9   : > { %v324_v44 = vsel %vm323_vm1, %v316_v40, %v315_v38 }
  0xca   : > { %v326_v45 = vsel %vm325_vm2, %v317_v42, %v324_v44 }
  0xcb   : > { %v328_v47 = vsel %vm327_vm3, %v318_v41, %v326_v45 }
  0xcc   : > { %v290_v49 = vpop.xlane.xlu0 %289  ;;  %v293_v50 = vpop.xlane.xlu1 %292  ;;  %v330_v54 = vsel %vm329_vm4, %v319_v46, %v328_v47 }
  0xcd   : > { %v301_v51 = vadd.f32 %v294_v29, %v290_v49  ;;  %v302_v52 = vadd.f32 %v294_v29, %v293_v50  ;;  %v332_v57 = vsel %vm331_vm5, %v320_v48, %v330_v54 }
  0xcf   : > { %v321_v55 = vperm.slane %v301_v51, %v314_v30  ;;  %v322_v56 = vperm.slane %v302_v52, %v314_v30 }
  0xd1   : > { %v334_v58 = vsel %vm333_vm6, %v321_v55, %v332_v57 }
  0xd2   : > { %v336_v59 = vsel %vm335_vm7, %v322_v56, %v334_v58 }
  0xd3   : > { %v338_v60 = vsel %vm304_vm8, -inf, %v336_v59 }
  0xd4   : > { %v340_v61 = vsel %vm339_vm9, %v338_v60, -inf }
  0xd5   : > { %341 = vmax.xlane.f32.xlu2 %v340_v61 }
 0x148   : > { %v342_v63 = vpop.xlane.xlu2 %341 }
 0x149   : > { %v343_v1 = vsub.f32 %v338_v60, %v342_v63 }
 0x14b   : > { %v344_v4 = vmul.f32 1.442695, %v343_v1 }
 0x14d   : > { %695 = vpow2.f32 %v344_v4 }
 0x153   : > { %v696_v5 = vpop.eup %695 }
 0x154   : > { %v346_v6 = vsel %vm339_vm9, %v696_v5, 0.0  ;;  %v378_v9 = vperm.slane %v696_v5, 2  ;;  %v371_v10 = vperm.slane %v696_v5, 1  ;;  %v385_v11 = vperm.slane %v696_v5, 3 }
 0x155   : > { %347 = vadd.xlane.f32.xlu0 %v346_v6  ;;  %v392_v13 = vperm.slane %v696_v5, 4  ;;  %v399_v14 = vperm.slane %v696_v5, 5  ;;  %v406_v15 = vperm.slane %v696_v5, 6  ;;  %v364_v16 = vperm.slane %v696_v5, 0 }
 0x156   : > { %383 = vperm.xlu2 %692, %v378_v9   ;;  %376 = vperm.xlu1 %691, %v371_v10   ;;  %v413_v17 = vperm.slane %v696_v5, 7 }
 0x15e   : > { %390 = vperm.xlu2 %692, %v385_v11   ;;  %397 = vperm.xlu1 %691, %v392_v13  }
 0x166   : > { %404 = vperm.xlu2 %692, %v399_v14   ;;  %411 = vperm.xlu1 %691, %v406_v15  }
 0x169   : > { %369 = vperm.xlu0 %693, %v364_v16  }
 0x16e   : > { %418 = vperm.xlu2 %692, %v413_v17  }
 0x1b0   : > { %v384_v18 = vpop.permute.xlu2 %383 }
 0x1b1   : > { %v422_v25 = vmul.f32 %v384_v18, %v953_v2 }
 0x1b3   : > { %v442_v28 = vsel %vm269_vm0, %v422_v25, 0.0 }
 0x1b4   : > { %v443_v37 = vrot.slane %v442_v28, 4 }
 0x1b6   : > { %v444_v41 = vadd.f32 %v443_v37, %v442_v28 }
 0x1b8   : > { %v391_v21 = vpop.permute.xlu2 %390  ;;  %v445_v49 = vrot.slane %v444_v41, 2 }
 0x1b9   : > { %v423_v27 = vmul.f32 %v391_v21, %v962_v8 }
 0x1ba   : > { %v446_v62 = vadd.f32 %v445_v49, %v444_v41 }
 0x1bb   : > { %v449_v34 = vsel %vm269_vm0, %v423_v27, 0.0 }
 0x1bc   : > { %v447_v21 = vrot.slane %v446_v62, 1 }
 0x1c0   : > { %v405_v22 = vpop.permute.xlu2 %404 }
 0x1c1   : > { %v425_v29 = vmul.f32 %v405_v22, %v967_v12  ;;  %v450_v12 = vrot.slane %v449_v34, 4 }
 0x1c3   : > { %v451_v46 = vadd.f32 %v450_v12, %v449_v34 }
 0x1c5   : > { %v452_v55 = vrot.slane %v451_v46, 2 }
 0x1c7   : > { %v453_v6 = vadd.f32 %v452_v55, %v451_v46 }
 0x1c8   : > { %v377_v23 = vpop.permute.xlu1 %376  ;;  %v348_v24 = vpop.xlane.xlu0 %347 }
 0x1c9   : > { %697 = vrcp.f32 %v348_v24  ;;  %v421_v26 = vmul.f32 %v377_v23, %v960_v7  ;;  %v419_v30 = vpop.permute.xlu2 %418  ;;  %v463_v7 = vsel %vm269_vm0, %v425_v29, 0.0  ;;  %v360_v56 = vand.u32 2147483648, %v348_v24 }
 0x1ca   : > { %v427_v2 = vmul.f32 %v419_v30, %v977_v20  ;;  %v464_v42 = vrot.slane %v463_v7, 4  ;;  %vm354_vm11 = vweird.f32 %v348_v24  ;;  %v358_v60 = vand.u32 2147483647, %v348_v24 }
 0x1cb   : > { %v435_v32 = vsel %vm269_vm0, %v421_v26, 0.0  ;;  %v361_v9 = vor.u32 1.1754944e-38, %v360_v56  ;;  %v454_v22 = vrot.slane %v453_v6, 1 }
 0x1cc   : > { %v436_v8 = vrot.slane %v435_v32, 4  ;;  %v477_v43 = vsel %vm269_vm0, %v427_v2, 0.0  ;;  %v465_v50 = vadd.f32 %v464_v42, %v463_v7  ;;  %vm359_vm13 = vcmp.eq.f32.partialorder %v358_v60, 8.507059e+37 }
 0x1cd   : > { %v478_v48 = vrot.slane %v477_v43, 4  ;;  %v455_v34 = vadd.f32 %v454_v22, %v453_v6 }
 0x1ce   : > { %v437_v44 = vadd.f32 %v436_v8, %v435_v32  ;;  %v466_v63 = vrot.slane %v465_v50, 2 }
 0x1cf   : > { %v698_v31 = vpop.eup %697  ;;  %v479_v59 = vadd.f32 %v478_v48, %v477_v43 }
 0x1d0   : > { %v398_v33 = vpop.permute.xlu1 %397  ;;  %v350_v35 = vmul.f32 %v698_v31, %v348_v24  ;;  %v438_v51 = vrot.slane %v437_v44, 2  ;;  %vm355_vm10 = vweird.f32 %v698_v31  ;;  %v467_v17 = vadd.f32 %v466_v63, %v465_v50 }
 0x1d1   : > { %v424_v36 = vmul.f32 %v398_v33, %v955_v3  ;;  %vm356_vm12 = vmor %vm354_vm11, %vm355_vm10  ;;  %v480_v13 = vrot.slane %v479_v59, 2  ;;  %v448_v33 = vadd.f32 %v447_v21, %v446_v62 }
 0x1d2   : > { %v351_v38 = vsub.f32 1.0, %v350_v35  ;;  %v439_v1 = vadd.f32 %v438_v51, %v437_v44  ;;  %v468_v29 = vrot.slane %v467_v17, 1 }
 0x1d3   : > { %v456_v39 = vsel %vm269_vm0, %v424_v36, 0.0  ;;  %v481_v24 = vadd.f32 %v480_v13, %v479_v59 }
 0x1d4   : > { %v457_v40 = vrot.slane %v456_v39, 4  ;;  %v352_v45 = vmul.f32 %v698_v31, %v351_v38  ;;  %v440_v18 = vrot.slane %v439_v1, 1  ;;  %v469_v12 = vadd.f32 %v468_v29, %v467_v17 }
 0x1d5   : > { %v482_v36 = vrot.slane %v481_v24, 1 }
 0x1d6   : > { %v458_v47 = vadd.f32 %v457_v40, %v456_v39  ;;  %v353_v52 = vadd.f32 %v698_v31, %v352_v45  ;;  %v441_v30 = vadd.f32 %v440_v18, %v439_v1 }
 0x1d7   : > { %v483_v45 = vadd.f32 %v482_v36, %v481_v24 }
 0x1d8   : > { %v412_v3 = vpop.permute.xlu1 %411  ;;  %v459_v57 = vrot.slane %v458_v47, 2  ;;  %v357_v4 = vsel %vm356_vm12, %v698_v31, %v353_v52 }
 0x1d9   : > { %v426_v20 = vmul.f32 %v412_v3, %v975_v19  ;;  %v362_v15 = vsel %vm359_vm13, %v361_v9, %v357_v4 }
 0x1da   : > { %v460_v10 = vadd.f32 %v459_v57, %v458_v47  ;;  %v485_v25 = vrot.slane %v362_v15, 1  ;;  %v486_v28 = vrot.slane %v362_v15, 2  ;;  %v487_v31 = vrot.slane %v362_v15, 3 }
 0x1db   : > { %v470_v53 = vsel %vm269_vm0, %v426_v20, 0.0  ;;  %v370_v54 = vpop.permute.xlu0 %369  ;;  %v489_v7 = vrot.slane %v362_v15, 5  ;;  %v488_v8 = vrot.slane %v362_v15, 4  ;;  %v491_v42 = vrot.slane %v362_v15, 7 }
 0x1dc   : > { %v471_v58 = vrot.slane %v470_v53, 4  ;;  %v420_v61 = vmul.f32 %v370_v54, %v948_v0  ;;  %v461_v23 = vrot.slane %v460_v10, 1  ;;  %v501_v37 = vmul.f32 %v485_v25, %v441_v30 }
 0x1dd   : > { %v502_v39 = vmul.f32 %v486_v28, %v448_v33  ;;  %v503_v40 = vmul.f32 %v487_v31, %v455_v34  ;;  %v490_v44 = vrot.slane %v362_v15, 6  ;;  %v505_v3 = vmul.f32 %v489_v7, %v469_v12 }
 0x1de   : > { %v472_v19 = vadd.f32 %v471_v58, %v470_v53  ;;  %v428_v5 = vsel %vm269_vm0, %v420_v61, 0.0  ;;  %v462_v35 = vadd.f32 %v461_v23, %v460_v10  ;;  %v516_v46 = vrot.slane %v501_v37, 7 }
 0x1df   : > { %v429_v14 = vrot.slane %v428_v5, 4  ;;  %v518_v20 = vrot.slane %v502_v39, 6  ;;  %v520_v49 = vrot.slane %v503_v40, 5  ;;  %v507_v51 = vmul.f32 %v491_v42, %v483_v45 }
 0x1e0   : > { %v473_v11 = vrot.slane %v472_v19, 2  ;;  %v504_v43 = vmul.f32 %v488_v8, %v462_v35  ;;  %v524_v55 = vrot.slane %v505_v3, 3 }
 0x1e1   : > { %v430_v0 = vadd.f32 %v429_v14, %v428_v5  ;;  %v528_v59 = vrot.slane %v507_v51, 1 }
 0x1e2   : > { %v474_v16 = vadd.f32 %v473_v11, %v472_v19  ;;  %v522_v52 = vrot.slane %v504_v43, 4 }
 0x1e3   : > { %v431_v26 = vrot.slane %v430_v0, 2 }
 0x1e4   : > { %v475_v27 = vrot.slane %v474_v16, 1 }
 0x1e5   : > { %v432_v32 = vadd.f32 %v431_v26, %v430_v0 }
 0x1e6   : > { %v476_v38 = vadd.f32 %v475_v27, %v474_v16 }
 0x1e7   : > { %v433_v2 = vrot.slane %v432_v32, 1 }
 0x1e8   : > { %v506_v48 = vmul.f32 %v490_v44, %v476_v38 }
 0x1e9   : > { %v434_v41 = vadd.f32 %v433_v2, %v432_v32 }
 0x1ea   : > { %v526_v56 = vrot.slane %v506_v48, 2 }
 0x1eb   : > { %v500_v47 = vmul.f32 %v434_v41, %v362_v15 }
 0x1ed   : > { %v517_v50 = vsel %vm323_vm1, %v516_v46, %v500_v47 }
 0x1ee   : > { %v519_v53 = vsel %vm325_vm2, %v518_v20, %v517_v50 }
 0x1ef   : > { %v521_v54 = vsel %vm327_vm3, %v520_v49, %v519_v53 }
 0x1f0   : > { %v523_v57 = vsel %vm329_vm4, %v522_v52, %v521_v54 }
 0x1f1   : > { %v525_v58 = vsel %vm331_vm5, %v524_v55, %v523_v57 }
 0x1f2   : > { %v527_v60 = vsel %vm333_vm6, %v526_v56, %v525_v58 }
 0x1f3   : > { %v529_v61 = vsel %vm335_vm7, %v528_v59, %v527_v60 }
 0x1f4   : > { %531 = vst.msk [vmem:[%s238_s3] sm:$0xff] %vm269_vm0, %v529_v61 }
 0x1f5   : > { %765 = shalt.err (!%p762_p0)
}
 0x1f6   : > { %650 = dma.vmem_to_hbm [thread:$0]  (%p881_p9), %s546_s5, 128, %s548_s8, %s533_s9  }
 0x1f7 PF: > { %s559_s30 = sand.u32 1, %s792_s17   ;;  %p1063_p1 = scmp.ge.s32.totalorder %s804_s20, 2 }
 0x1f8   : > { %s560_s11 = scalar_lea.sflag [#allocation5], %s559_s30 }
 0x1f9   : > { %p653_p2 = pnand %p1063_p1, %p885_p10 }
 0x1fb   : > { %p654_p3 = pneg %p653_p2 }
 0x1fd   : > { %787 = dma.done.wait (%p654_p3), %s560_s11, 128  }
 0x1fe   : > { %789 = vsyncadd (%p654_p3), %s560_s11, 4294967168  ;;  %p18_p4 = scmp.ge.s32.totalorder %s862_s22, 4   ;;  %s1064_s17 = smov %s796_s18 }
 0x1ff   : > { %s1065_s18 = smov %s800_s19  ;;  %s1066_s19 = smov %s874_s25 }
 0x200   : > { %s1067_s20 = smov %s862_s22  ;;  %20 = sbr.rel (!%p18_p4) target bundleno = 7 (0x7), region = 84 }
 0x205   :  { %566 = vsyncpa [#allocation4], 1 }
 0x206   :  { %568 = vsyncpa [#allocation4 + $0x1], 1 }
 0x207   :  { %569 = vsyncpa [#allocation5], 1 }
 0x208   :  { %571 = vsyncpa [#allocation5 + $0x1], 1 }

</bundles_post_ra>
